<compile_context>
chip_gen: v5e
topology: v5e:2x2
jax: 0.10.0
libtpu: 0.0.40
codegen_flags: <defaults>
</compile_context>

<pallas_src>
import numpy as np
import jax
import jax.numpy as jnp
from jax.experimental import pallas as pl
from jax.experimental.pallas import tpu as pltpu

SCALES = [0.25, 0.5, 0.75, 1, 1.25, 1.5, 1.75, 2]
NUM_EXPERTS = len(SCALES)
HIDDEN = 128
COMPUTE_DTYPE = jnp.bfloat16   # MXU input dtype; accumulation stays f32


# ----------------------------------------------------------------------------
# helpers (glue)
# ----------------------------------------------------------------------------
def _nearest_idx(out_size, in_size):
    # PyTorch F.interpolate(mode='nearest') index rule: floor(dst * in / out).
    # (PyTorch uses a float scale; this integer floor can differ by one index
    #  for some (out,in) pairs — matches the reference below either way.)
    if out_size <= 0:
        return np.zeros((0,), np.int32)
    return np.minimum((np.arange(out_size) * in_size) // out_size,
                      in_size - 1).astype(np.int32)


def _round_up(n, q):
    return ((n + q - 1) // q) * q


def _largest_aligned_divisor(n, q, cap):
    """Largest d with d % q == 0, n % d == 0, d <= cap (n is a multiple of q)."""
    cap = max(q, min(cap, n))
    cap = (cap // q) * q
    for d in range(cap, q - 1, -q):
        if n % d == 0:
            return d
    return q


# ----------------------------------------------------------------------------
# Gating MLP (Linear->ReLU->Linear->ReLU->Linear->Softmax) — plain JAX / XLA.
# ----------------------------------------------------------------------------
def gating_mlp(conds, params):
    h1 = jnp.maximum(jnp.dot(conds, params["W1"]) + params["b1"], 0.0)
    h2 = jnp.maximum(jnp.dot(h1, params["W2"]) + params["b2"], 0.0)
    logits = jnp.dot(h2, params["W3"]) + params["b3"]
    return jax.nn.softmax(logits, axis=1)


# ----------------------------------------------------------------------------
# Pallas kernel: expert-mixture time resampling as a per-batch matmul.
# ----------------------------------------------------------------------------
def _mix_kernel(m_ref, x_ref, o_ref):
    # m_ref: (TB, T_in)  bf16  — per-batch mixing block (precomputed in XLA)
    # x_ref: (T_in, CB)  bf16  — lane-dense activation slab (batch squeezed)
    # o_ref: (TB, CB)    f32   — output block (batch squeezed)
    o_ref[...] = jnp.dot(
        m_ref[...], x_ref[...], preferred_element_type=jnp.float32
    ).astype(o_ref.dtype)


def time_scaling_mix(x, expert_weight, tgt_sample):
    bs, ch, t_in, w_in, h_in = x.shape
    t, w, h = tgt_sample
    E = NUM_EXPERTS

    # ---- spatial nearest-neighbour gather (identical for every expert) and
    #      layout change to a lane-dense (B, T_in, C_pad) bf16 slab.
    # TODO(synk): the gather/transpose/cast pass and the final output
    # transpose are extra HBM passes; fuse them into the pallas_call operand
    # (allow_input_fusion) or keep x in its natural (B,ch,T,w*h) layout when
    # w*h is lane-sized, instead of materialising x_k.
    wi = _nearest_idx(w, w_in)
    hi = _nearest_idx(h, h_in)
    C = ch * w * h
    C_pad = _round_up(C, 128)   # lane-dense output  -> unmasked vst
    T_pad = _round_up(t, 8)     # sublane-dense rows -> clean (8,128) tiling

    x_sp = x[:, :, :, wi, :][:, :, :, :, hi]                      # (B,ch,T_in,w,h)
    x_k = jnp.transpose(x_sp, (0, 2, 1, 3, 4)).reshape(bs, t_in, C)
    x_k = x_k.astype(COMPUTE_DTYPE)
    if C_pad != C:
        x_k = jnp.pad(x_k, ((0, 0), (0, 0), (0, C_pad - C)))

    # ---- static per-expert nearest-time gather matrices with ExpertClip's
    #      truncate / zero-pad semantics baked in (rows >= min(ts,t) are zero).
    G = np.zeros((E, T_pad, t_in), np.float32)
    for e, s in enumerate(SCALES):
        ts = int(t * s)
        idx = _nearest_idx(ts, t_in)
        nv = min(ts, t)
        if nv > 0:
            G[e, np.arange(nv), idx[:nv]] = 1.0

    # ---- fold the experts in XLA: M[b] = sum_e w[b,e] * G[e]  (tiny tensor).
    M = jnp.einsum("be,etk->btk", expert_weight.astype(jnp.float32),
                   jnp.asarray(G)).astype(COMPUTE_DTYPE)

    # ---- tile sizing against the device's VMEM budget (generation aware).
    try:
        vmem_phys = int(pltpu.get_tpu_info().vmem_capacity_bytes)
    except Exception:
        vmem_phys = 64 * 1024 * 1024          # v7x per-core floor
    vmem_limit = min((vmem_phys * 3) // 4, 100 * 1024 * 1024)
    tile_budget = vmem_limit // 2             # headroom for compiler scratch

    in_b = jnp.dtype(COMPUTE_DTYPE).itemsize
    out_b = 4

    def _working_set(tb, cb):                 # double-buffered per-step bytes
        return 2 * (tb * t_in * in_b + t_in * cb * in_b + tb * cb * out_b)

    TB = T_pad                                # prefer full T (one M fetch per C block)
    CB = _largest_aligned_divisor(C_pad, 128, 8192)
    while _working_set(TB, CB) > tile_budget and CB > 128:
        CB = _largest_aligned_divisor(C_pad, 128, CB - 128)
    while _working_set(TB, CB) > tile_budget and TB > 8:
        TB = _largest_aligned_divisor(T_pad, 8, TB - 8)

    # T-block axis innermost: x's block index (b, 0, jc) is constant across it,
    # so the large x block stays resident; only the small M block is re-fetched.
    grid = (bs, C_pad // CB, T_pad // TB)

    cost = pl.CostEstimate(
        flops=2 * bs * T_pad * t_in * C_pad,
        transcendentals=0,
        bytes_accessed=int(M.size) * in_b + int(x_k.size) * in_b
        + bs * T_pad * C_pad * out_b,
    )

    out = pl.pallas_call(
        _mix_kernel,
        out_shape=jax.ShapeDtypeStruct((bs, T_pad, C_pad), jnp.float32),
        grid=grid,
        in_specs=[
            # mixing matrix: (TB, T_in) per (batch, T block); constant over jc
            pl.BlockSpec((None, TB, t_in), lambda b, jc, jt: (b, jt, 0)),
            # x slab: (T_in, CB) per (batch, C block); constant over inner jt
            pl.BlockSpec((None, t_in, CB), lambda b, jc, jt: (b, 0, jc)),
        ],
        out_specs=pl.BlockSpec((None, TB, CB), lambda b, jc, jt: (b, jt, jc)),
        compiler_params=pltpu.CompilerParams(
            # No cross-step state -> every axis may shard across TensorCores.
            dimension_semantics=("parallel", "parallel", "parallel"),
            vmem_limit_bytes=vmem_limit,
        ),
        cost_estimate=cost,
    )(M, x_k)

    out = out[:, :t, :C]                                  # drop T / lane padding
    return out.reshape(bs, t, ch, w, h).transpose(0, 2, 1, 3, 4)


def time_scaling_forward(x, conds, params, tgt_sample):
    expert_weight = gating_mlp(conds, params)
    mixed = time_scaling_mix(x, expert_weight, tgt_sample)
    return mixed, expert_weight


# ----------------------------------------------------------------------------
# pure-JAX reference (mirrors the PyTorch semantics) for validation
# ----------------------------------------------------------------------------
def reference_mix(x, expert_weight, tgt_sample):
    bs, ch, t_in, w_in, h_in = x.shape
    t, w, h = tgt_sample
    wi = _nearest_idx(w, w_in)
    hi = _nearest_idx(h, h_in)
    acc = jnp.zeros((bs, ch, t, w, h), jnp.float32)
    for e, s in enumerate(SCALES):
        ts = int(t * s)
        ti = _nearest_idx(ts, t_in)
        xe = x[:, :, ti, :, :][:, :, :, wi, :][:, :, :, :, hi]
        if ts > t:
            xe = xe[:, :, :t]
        elif ts < t:
            pad = jnp.zeros((bs, ch, t - ts, w, h), jnp.float32)
            xe = jnp.concatenate([xe, pad], axis=2)
        acc = acc + expert_weight[:, e][:, None, None, None, None] * xe
    return acc


def reference_mlp(conds, p):
    h1 = jnp.maximum(jnp.dot(conds, p["W1"]) + p["b1"], 0.0)
    h2 = jnp.maximum(jnp.dot(h1, p["W2"]) + p["b2"], 0.0)
    logits = jnp.dot(h2, p["W3"]) + p["b3"]
    return jax.nn.softmax(logits, axis=1)


# ----------------------------------------------------------------------------
if __name__ == "__main__":
    bs, ch = 2, 4
    t_in, w_in, h_in = 10, 6, 6
    tgt_sample = (8, 8, 8)
    num_conds = 4

    key = jax.random.PRNGKey(0)
    kx, kc, k1, k2, k3, k4, k5, k6 = jax.random.split(key, 8)

    x = jax.random.normal(kx, (bs, ch, t_in, w_in, h_in), jnp.float32)
    conds = jax.random.normal(kc, (bs, num_conds), jnp.float32)

    # synthetic parameters for Linear(num_conds,128), Linear(128,128),
    # Linear(128,8); stored as (in, out) so the forward computes x @ W + b.
    params = {
        "W1": jax.random.normal(k1, (num_conds, HIDDEN), jnp.float32) / np.sqrt(num_conds),
        "b1": jax.random.normal(k2, (1, HIDDEN), jnp.float32) * 0.01,
        "W2": jax.random.normal(k3, (HIDDEN, HIDDEN), jnp.float32) / np.sqrt(HIDDEN),
        "b2": jax.random.normal(k4, (1, HIDDEN), jnp.float32) * 0.01,
        "W3": jax.random.normal(k5, (HIDDEN, NUM_EXPERTS), jnp.float32) / np.sqrt(HIDDEN),
        "b3": jax.random.normal(k6, (1, NUM_EXPERTS), jnp.float32) * 0.01,
    }

    out, expert_weight = time_scaling_forward(x, conds, params, tgt_sample)
    jax.block_until_ready((out, expert_weight))

    # sanity / correctness checks
    ew_ref = reference_mlp(conds, params)
    np.testing.assert_allclose(np.asarray(expert_weight), np.asarray(ew_ref),
                               atol=1e-5, rtol=1e-5)
    np.testing.assert_allclose(np.asarray(expert_weight).sum(axis=1),
                               np.ones(bs), atol=1e-5)
    out_ref = reference_mix(x, expert_weight, tgt_sample)
    # bf16 MXU inputs (f32 accumulation) -> looser tolerance vs the f32 reference.
    np.testing.assert_allclose(np.asarray(out), np.asarray(out_ref),
                               atol=5e-2, rtol=5e-2)
    assert out.shape == (bs, ch, tgt_sample[0], tgt_sample[1], tgt_sample[2])
    assert expert_weight.shape == (bs, NUM_EXPERTS)

    print("KERNEL_OK")
</pallas_src>

<mosaic_0001>
module attributes {stable_mosaic.version = 11 : i64} {
  func.func @_mix_kernel(%arg0: i32, %arg1: i32, %arg2: i32, %arg3: memref<1x8x10xbf16, #tpu.memory_space<vmem>>, %arg4: memref<1x10x256xbf16, #tpu.memory_space<vmem>>, %arg5: memref<1x8x256xf32, #tpu.memory_space<vmem>>) attributes {dimension_semantics = [#tpu.dimension_semantics<parallel>, #tpu.dimension_semantics<parallel>, #tpu.dimension_semantics<parallel>], iteration_bounds = array<i64: 2, 1, 1>, scalar_prefetch = 0 : i64, scratch_operands = 0 : i64, tpu.core_type = #tpu.core_type<tc>, window_params = [{transform_indices = @transform_0, window_bounds = array<i64: 1, 8, 10>}, {transform_indices = @transform_1, window_bounds = array<i64: 1, 10, 256>}, {transform_indices = @transform_2, window_bounds = array<i64: 1, 8, 256>}]} {
    %c0 = arith.constant 0 : index
    %c0_0 = arith.constant 0 : index
    %c0_1 = arith.constant 0 : index
    %0 = vector.load %arg3[%c0, %c0_0, %c0_1] : memref<1x8x10xbf16, #tpu.memory_space<vmem>>, vector<1x8x10xbf16>
    %1 = vector.shape_cast %0 : vector<1x8x10xbf16> to vector<8x10xbf16>
    %c0_2 = arith.constant 0 : index
    %c0_3 = arith.constant 0 : index
    %c0_4 = arith.constant 0 : index
    %2 = vector.load %arg4[%c0_2, %c0_3, %c0_4] : memref<1x10x256xbf16, #tpu.memory_space<vmem>>, vector<1x10x256xbf16>
    %3 = vector.shape_cast %2 : vector<1x10x256xbf16> to vector<10x256xbf16>
    %cst = arith.constant dense<0.000000e+00> : vector<8x256xf32>
    %4 = tpu.matmul %1, %3, %cst {dimension_numbers = #tpu.dot_dimension_numbers<[1], [0], [0], [1], [0, 0, 1, 1], [], []>} : vector<8x10xbf16>, vector<10x256xbf16>, vector<8x256xf32> -> vector<8x256xf32>
    %c0_5 = arith.constant 0 : index
    %c0_6 = arith.constant 0 : index
    %c0_7 = arith.constant 0 : index
    %5 = vector.load %arg5[%c0_5, %c0_6, %c0_7] : memref<1x8x256xf32, #tpu.memory_space<vmem>>, vector<1x8x256xf32>
    %6 = vector.shape_cast %5 : vector<1x8x256xf32> to vector<8x256xf32>
    %7 = vector.shape_cast %4 : vector<8x256xf32> to vector<1x8x256xf32>
    tpu.vector_store %arg5[%c0_5, %c0_6, %c0_7], %7 {strides = array<i32>} : memref<1x8x256xf32, #tpu.memory_space<vmem>>, vector<1x8x256xf32>,
    return
  }
  func.func @transform_0(%arg0: i32, %arg1: i32, %arg2: i32) -> (i32, i32, i32) {
    %c0_i32 = arith.constant 0 : i32
    %c0_i32_0 = arith.constant 0 : i32
    return %arg0, %arg2, %c0_i32 : i32, i32, i32
  }
  func.func @transform_1(%arg0: i32, %arg1: i32, %arg2: i32) -> (i32, i32, i32) {
    %c0_i32 = arith.constant 0 : i32
    %c0_i32_0 = arith.constant 0 : i32
    return %arg0, %c0_i32, %arg1 : i32, i32, i32
  }
  func.func @transform_2(%arg0: i32, %arg1: i32, %arg2: i32) -> (i32, i32, i32) {
    %c0_i32 = arith.constant 0 : i32
    return %arg0, %arg2, %arg1 : i32, i32, i32
  }
}

</mosaic_0001>

<bundles_post_ra>
// kernel: tpu_custom_call.1
= control target key start
LH: loop header
LB: loop body
LE: loop exit
PB: predicated region body
PF: predicated region fallthrough
CT: control target
= control target key end

     0   :  { %7 = vsyncpa [#allocation3], 0  ;;  %s656_s0 = inlined_call_operand.vmem [shape: bf16[2,8,10], index: 0, kind: input, shape index: {}]   ;;  %s657_s1 = inlined_call_operand.vmem [shape: bf16[2,10,256], index: 1, kind: input, shape index: {}]   ;;  %s658_s2 = inlined_call_operand.hbm [shape: f32[2,8,256], index: 2, kind: output, shape index: {}]  }
   0x1   :  { %9 = vsyncpa [#allocation3 + $0x1], 0  ;;  %s556_s9 = smov 0   ;;  %s558_s10 = smov 0  }
   0x2   :  { %s560_s11 = smov 0   ;;  %s562_s12 = smov 0  }
   0x3   :  { %s564_s13 = smov 0   ;;  %s566_s14 = smov 0  }
   0x4 LB: > { %s378_s15 = sadd.s32 4294967295, %s539_s14   ;;  %s379_s16 = sadd.s32 4294967294, %s539_s14   ;;  %s539_s14 = sphi %s566_s14, %s15_s14   ;;  %s535_s13 = sphi %s564_s13, %s665_s13   ;;  %s531_s12 = sphi %s562_s12, %s664_s12   ;;  %s527_s11 = sphi %s560_s11, %s663_s11   ;;  %s523_s10 = sphi %s558_s10, %s662_s10   ;;  %s519_s9 = sphi %s556_s9, %s661_s9  }
   0x5   : > { %s34_s17 = sadd.s32 1, %s535_s13  ;;  %s101_s18 = sadd.s32 1, %s527_s11 }
   0x6   : > { %p36_p0 = scmp.ge.s32.totalorder %s34_s17, 2  ;;  %p111_p1 = scmp.ne.s32.totalorder %s527_s11, %s523_s10 }
   0x7   : > { %p112_p2 = scmp.eq.s32.totalorder %s378_s15, 1  ;;  %p117_p3 = scmp.ne.s32.totalorder %s523_s10, %s519_s9 }
   0x8   : > { %s667_s17 = smov (%p36_p0, %s34_s17), 0  ;;  %p118_p5 = scmp.eq.s32.totalorder %s379_s16, 1 }
   0x9   : > { %p596_p4 = por %p112_p2, %p111_p1  ;;  %s94_s20 = ssub.s32 %s535_s13, %s667_s17 }
   0xa   : > { %p382_p6 = scmp.ge.s32.totalorder %s539_s14, 1  ;;  %p99_p7 = scmp.eq.s32.totalorder %s94_s20, 0 }
   0xb   : > { %p603_p8 = por %p118_p5, %p117_p3  ;;  %p159_p9 = scmp.lt.s32.totalorder %s539_s14, 3 }
   0xc   : > { %s609_s22 = scalar_select %p99_p7, %s527_s11, %s101_s18  }
   0xd   : > { %p160_p10 = pnand %p382_p6, %p159_p9 }
   0xe   : > { %p192_p11 = scmp.lt.s32.totalorder (!%p160_p10), %s531_s12, 1  ;;  %s189_s4 = sand.u32 (!%p160_p10), 1, %s523_s10  }
   0xf   : > { %163 = sbr.rel (%p160_p10) target bundleno = 166 (0xa6), region = 28  ;;  %s405_s5 = sshll.u32 (!%p160_p10), %s531_s12, 4 }
  0x10   : > { %s383_s6 = sshll.u32 (!%p160_p10), %s189_s4, 4  ;;  %s277_s15 = scalar_lea.hbm (!%p160_p10), %s658_s2, %s405_s5 }
  0x11   : > { %s191_s16 = scalar_lea.vmem (!%p160_p10), [#allocation2], %s383_s6  ;;  %s281_s20 = sshll.u32 (!%p160_p10), %s277_s15, 4  ;;  %s282_s20 = int_to_ptr.hbm [resolvable:$true] %s281_s20 }
  0x12   : > { %s279_s18 = sshll.u32 (!%p160_p10), %s191_s16, 4  ;;  %s481_s27 = scalar_lea.hbm (!%p160_p10), %s658_s2, 32  ;;  %s280_s18 = int_to_ptr.vmem [resolvable:$true] %s279_s18 }
  0x14   : > { %s193_s23 = scalar_select %p192_p11, %s531_s12, 1  ;;  %vm226_vm0 = vcmask 1044480   ;;  %vm222_vm1 = vcmask 80896  }
  0x16   : > { %s402_s24 = sshll.u32 %s193_s23, 4  ;;  %s384_s25 = sshll.u32 %s193_s23, 2 }
  0x17   : > { %s207_s28 = scalar_lea.vmem %s657_s1, %s402_s24  ;;  %s198_s3 = scalar_lea.vmem %s656_s0, %s384_s25 }
  0x18   : > { %v389_v0 = vld [vmem:[%s207_s28] sm:$0xf]  ;;  %v404_v1 = vld [vmem:[%s207_s28 + $0x4] sm:$0x10]  ;;  %v403_v2 = vld [vmem:[%s207_s28 + $0x4] sm:$0xf] }
  0x19   : > { %v390_v3 = vor.u32 %v404_v1, %v389_v0  ;;  %v391_v4 = vld [vmem:[%s207_s28 + $0x8] sm:$0x10]  ;;  %v211_v8 = vld [vmem:[%s198_s3] sm:$0xf]  ;;  %s262_s23 = scalar_lea.sflag [#allocation3], %s189_s4  ;;  %s475_s24 = sshra.s32 %s282_s20, 4  ;;  %s476_s24 = int_to_ptr.hbm [resolvable:$true] %s475_s24 }
  0x1a   : > { %v394_v5 = vor.u32 %v403_v2, %v391_v4  ;;  %s477_s25 = scalar_lea.hbm %s476_s24, 16  ;;  %p482_p1 = scmp.lt.s32.totalorder %s476_s24, %s658_s2 }
  0x1b   : > { %v228_v6 = vsel %vm226_vm0, %v390_v3, 0  ;;  %p478_p12 = scmp.ne.s32.totalorder %s476_s24, %s477_s25  ;;  %p483_p2 = scmp.lt.s32.totalorder %s481_s27, %s477_s25 }
  0x1c   : > { %240 = vmatpush.bf16.msra.mxu0 %v228_v6  ;;  %v231_v7 = vsel %vm226_vm0, %v394_v5, 0 }
  0x1d   : > { %253 = vmatpush.bf16.msra.mxu1 %v231_v7  ;;  %p479_p13 = pnand %p478_p12, %p596_p4  ;;  %p484_p3 = por %p483_p2, %p482_p1 }
  0x1f   : > { %395 = vmatmul.msk.bf16.vlgmr.msra.gmra.mxu0 %vm222_vm1, %v211_v8  ;;  %p480_p0 = pneg %p479_p13 }
  0x20   : > { %396 = vmatmul.msk.bf16.vlgmr.msra.gmra.mxu1 %vm222_vm1, %v211_v8 }
  0x21   : > { %p485_p5 = pnand %p484_p3, %p480_p0 }
  0x9c   : > { %v242_v9 = vpop.f32.mrf.mxu0 }
  0x9d   : > { %259 = vst [vmem:[%s191_s16] sm:$0xff] %v242_v9  ;;  %v255_v10 = vpop.f32.mrf.mxu1 }
  0x9e   : > { %260 = vst [vmem:[%s191_s16 + $0x8] sm:$0xff] %v255_v10 }
  0x9f   : > { %488 = shalt.err (!%p485_p5)
}
  0xa0   : > { %406 = dma.vmem_to_hbm [thread:$0]  (%p596_p4), %s280_s18, 256, %s282_s20, %s262_s23  }
  0xa4   : > { %v244_v11 = vpop.f32.mrf.mxu0 }
  0xa5   : > { %v257_v12 = vpop.f32.mrf.mxu1 }
  0xa6 PF: > { %p412_p6 = scmp.ge.s32.totalorder %s539_s14, 2  ;;  %s293_s30 = sand.u32 1, %s519_s9  }
  0xa7   : > { %s294_s3 = scalar_lea.sflag [#allocation3], %s293_s30 }
  0xa8   : > { %p409_p7 = pnand %p412_p6, %p603_p8 }
  0xaa   : > { %p410_p9 = pneg %p409_p7 }
  0xac   : > { %514 = dma.done.wait (%p410_p9), %s294_s3, 256  }
  0xad   : > { %516 = vsyncadd (%p410_p9), %s294_s3, 4294967040  ;;  %s15_s14 = sadd.s32 1, %s539_s14   ;;  %s661_s9 = smov %s523_s10 }
  0xae   : > { %p12_p10 = scmp.ge.s32.totalorder %s15_s14, 4   ;;  %s662_s10 = smov %s527_s11 }
  0xaf   : > { %s663_s11 = smov %s609_s22  ;;  %s664_s12 = smov %s535_s13 }
  0xb0   : > { %s665_s13 = smov %s667_s17  ;;  %14 = sbr.rel (!%p12_p10) target bundleno = 4 (0x4), region = 66 }
  0xb5   :  { %300 = vsyncpa [#allocation3], 1 }
  0xb6   :  { %302 = vsyncpa [#allocation3 + $0x1], 1 }

</bundles_post_ra>
